<compile_context>
chip_gen: v5e
topology: v5e:2x2
jax: 0.10.0
libtpu: 0.0.40
codegen_flags: <defaults>
</compile_context>

<pallas_src>
import jax
import jax.numpy as jnp
from jax import lax
from jax.experimental import pallas as pl
from jax.experimental.pallas import tpu as pltpu

# ----------------------------- configuration -------------------------------
B = 2          # batch
S = 8          # encoder sequence length
SD = 8         # decoder / labels sequence length
D = 128        # d_model
V = 256        # vocab size
T = 32         # total_bank_tokens
K = 8          # total_virtual_tokens
PAD_ID = 0     # pad_token_id (T5 default)
START_ID = 0   # decoder_start_token_id (T5 default)
M = B * SD     # flattened decoder tokens


# ------------------------------ Pallas kernel -------------------------------
def fused_forward_kernel(x_ref, wte_ref, bank_ref, rw_ref, rb_ref, ids_ref,
                         prompt_ref, logits_ref, loss_ref):
    """Routing soft prompt + fused dec-emb gather + tied LM head + masked CE."""
    # ---------------- routing soft prompt (get_prompt, 'routing') -----------
    x = x_ref[...]                                            # (B, S, D) f32
    pooled = jnp.mean(x, axis=1)                              # (B, D) f32
    # scores = pooled @ route_w^T + b   (contract on D, bf16 on the MXU)
    scores = lax.dot_general(
        pooled.astype(jnp.bfloat16), rw_ref[...],
        (((1,), (1,)), ((), ())),
        preferred_element_type=jnp.float32) + rb_ref[...]     # (B, T) f32
    smax = jnp.max(scores, axis=-1, keepdims=True)
    e = jnp.exp(scores - smax)
    probs = e / jnp.sum(e, axis=-1, keepdims=True)            # exact softmax
    mix = jnp.dot(probs.astype(jnp.bfloat16), bank_ref[...],
                  preferred_element_type=jnp.float32)         # (B, D) f32
    prompt_ref[...] = jnp.broadcast_to(
        mix[:, None, :], prompt_ref.shape).astype(prompt_ref.dtype)

    # ---------------- fused decoder-embedding gather ------------------------
    ids = ids_ref[...]                                        # (M, 2) i32
    dec_col = ids[:, 0:1]                                     # (M, 1) dec ids
    lab_col = ids[:, 1:2]                                     # (M, 1) labels
    col = lax.broadcasted_iota(jnp.int32, (M, V), 1)          # (M, V)
    onehot = (col == dec_col).astype(jnp.bfloat16)            # (M, V) selection
    wte = wte_ref[...]                                        # (V, D) bf16
    dec = jnp.dot(onehot, wte,
                  preferred_element_type=jnp.float32
                  ).astype(jnp.bfloat16)                      # (M, D) exact rows

    # ---------------- tied LM head (contract on D) --------------------------
    logits = lax.dot_general(dec, wte, (((1,), (1,)), ((), ())),
                             preferred_element_type=jnp.float32)  # (M, V) f32
    logits_ref[...] = logits

    # ---------------- masked token-level cross entropy ----------------------
    lmax = jnp.max(logits, axis=-1, keepdims=True)
    lse = lmax + jnp.log(jnp.sum(jnp.exp(logits - lmax), axis=-1, keepdims=True))
    picked = jnp.sum(jnp.where(col == lab_col, logits, 0.0),
                     axis=-1, keepdims=True)                  # (M, 1)
    valid = (lab_col != PAD_ID).astype(jnp.float32)           # (M, 1)
    nll_sum = jnp.sum((lse - picked) * valid)
    tok_count = jnp.sum(valid)
    # Direct division: all-ignored batch gives NaN, matching torch CE 'mean'.
    loss_ref[...] = (nll_sum / tok_count).reshape(1, 1)


# ------------------------------- wrapper ------------------------------------
def fused_forward_pallas(inputs_embeds, wte_bf16, bank_bf16, route_w_bf16,
                         route_b, ids2):
    vmem = pl.BlockSpec(memory_space=pltpu.MemorySpace.VMEM)
    return pl.pallas_call(
        fused_forward_kernel,
        out_shape=(
            jax.ShapeDtypeStruct((B, K, D), jnp.float32),     # soft prompts
            jax.ShapeDtypeStruct((M, V), jnp.float32),        # logits slab
            jax.ShapeDtypeStruct((1, 1), jnp.float32),        # mean CE loss
        ),
        in_specs=[vmem, vmem, vmem, vmem, vmem, vmem],
        out_specs=(vmem, vmem, vmem),
    )(inputs_embeds, wte_bf16, bank_bf16, route_w_bf16, route_b, ids2)


def shift_tokens_right(labels, start_id):
    shifted = jnp.roll(labels, 1, axis=-1)
    shifted = shifted.at[:, 0].set(start_id)
    # HF fidelity: replace possible -100 (ignored) positions with pad id.
    shifted = jnp.where(shifted < 0, PAD_ID, shifted)
    return shifted


def prepare_params(raw):
    """One-time parameter prep (casts), kept OUT of the jitted forward."""
    return {
        "word_embedding": raw["word_embedding"].astype(jnp.float32),   # (V, D)
        "wte_bf16": raw["word_embedding"].astype(jnp.bfloat16),        # (V, D)
        "bank_bf16": raw["bank_embedding"].astype(jnp.bfloat16),       # (T, D)
        "route_w_bf16": raw["route_w"].astype(jnp.bfloat16),           # (T, D)
        "route_b": raw["route_b"].astype(jnp.float32),                 # (1, T)
    }


def multibank_t5_forward(params, input_ids, labels):
    word_emb = params["word_embedding"]                              # (V, D) f32

    # encoder embedding gather (glue; feeds routing pool + backbone input)
    inputs_embeds = jnp.take(word_emb, input_ids, axis=0)            # (B, S, D)

    # decoder ids + labels packed into one small int32 tile for the kernel
    dec_ids = shift_tokens_right(labels, START_ID)                   # (B, SD)
    ids2 = jnp.stack(
        [dec_ids.reshape(-1), labels.reshape(-1)], axis=1
    ).astype(jnp.int32)                                              # (M, 2)

    prompts, logits_flat, loss11 = fused_forward_pallas(
        inputs_embeds, params["wte_bf16"], params["bank_bf16"],
        params["route_w_bf16"], params["route_b"], ids2)

    # soft prompt concatenated with encoder embeddings (backbone input)
    inputs_embeds_full = jnp.concatenate(
        [prompts.astype(inputs_embeds.dtype), inputs_embeds], axis=1)  # (B,K+S,D)
    # TODO(synk): inputs_embeds_full would feed the (unavailable) T5 backbone.
    del inputs_embeds_full

    logits = logits_flat.reshape(B, SD, V)
    loss = loss11[0, 0]
    return loss, logits


# --------------------------------- main -------------------------------------
if __name__ == "__main__":
    key = jax.random.PRNGKey(0)
    k1, k2, k3, k4 = jax.random.split(key, 4)

    # deterministic parameter init (shapes from the module's __init__)
    word_embedding = jax.random.normal(k1, (V, D), dtype=jnp.float32) * 0.02
    # 'frequent'-style bank init: rows of the word embedding table
    bank_embedding = word_embedding[10:10 + T].astype(jnp.float32)
    route_w = jax.random.normal(k2, (T, D), dtype=jnp.float32) * 0.02
    route_b = jnp.zeros((1, T), dtype=jnp.float32)

    raw_params = {
        "word_embedding": word_embedding,
        "bank_embedding": bank_embedding,
        "route_w": route_w,
        "route_b": route_b,
    }
    params = prepare_params(raw_params)        # one-time cast, outside jit
    params = jax.tree_util.tree_map(jax.block_until_ready, params)

    input_ids = jax.random.randint(k3, (B, S), 1, V)
    labels = jax.random.randint(k4, (B, SD), 0, V)   # 0 == pad -> ignored

    fwd = jax.jit(multibank_t5_forward)
    loss, logits = fwd(params, input_ids, labels)
    jax.block_until_ready((loss, logits))

    assert logits.shape == (B, SD, V)
    assert jnp.isfinite(loss).item()
    assert bool(jnp.all(jnp.isfinite(logits)))
    print("KERNEL_OK")
</pallas_src>

<mosaic_0001>
module attributes {stable_mosaic.version = 11 : i64} {
  func.func @fused_forward_kernel(%arg0: memref<2x8x128xf32, #tpu.memory_space<vmem>>, %arg1: memref<256x128xbf16, #tpu.memory_space<vmem>>, %arg2: memref<32x128xbf16, #tpu.memory_space<vmem>>, %arg3: memref<32x128xbf16, #tpu.memory_space<vmem>>, %arg4: memref<1x32xf32, #tpu.memory_space<vmem>>, %arg5: memref<16x2xi32, #tpu.memory_space<vmem>>, %arg6: memref<2x8x128xf32, #tpu.memory_space<vmem>>, %arg7: memref<16x256xf32, #tpu.memory_space<vmem>>, %arg8: memref<1x1xf32, #tpu.memory_space<vmem>>) attributes {dimension_semantics = [], scalar_prefetch = 0 : i64, scratch_operands = 0 : i64, tpu.core_type = #tpu.core_type<tc>} {
    %c0 = arith.constant 0 : index
    %c0_0 = arith.constant 0 : index
    %c0_1 = arith.constant 0 : index
    %0 = vector.load %arg0[%c0, %c0_0, %c0_1] : memref<2x8x128xf32, #tpu.memory_space<vmem>>, vector<2x8x128xf32>
    %cst = arith.constant dense<0.000000e+00> : vector<2x128xf32>
    %1 = vector.multi_reduction <add>, %0, %cst [1] : vector<2x8x128xf32> to vector<2x128xf32>
    %cst_2 = arith.constant 8.000000e+00 : f32
    %2 = vector.broadcast %cst_2 : f32 to vector<2x128xf32>
    %3 = arith.divf %1, %2 : vector<2x128xf32>
    %4 = arith.truncf %3 : vector<2x128xf32> to vector<2x128xbf16>
    %c0_3 = arith.constant 0 : index
    %c0_4 = arith.constant 0 : index
    %5 = vector.load %arg3[%c0_3, %c0_4] : memref<32x128xbf16, #tpu.memory_space<vmem>>, vector<32x128xbf16>
    %cst_5 = arith.constant dense<0.000000e+00> : vector<2x32xf32>
    %6 = tpu.matmul %4, %5, %cst_5 {dimension_numbers = #tpu.dot_dimension_numbers<[1], [1], [0], [0], [0, 0, 1, 0], [], []>} : vector<2x128xbf16>, vector<32x128xbf16>, vector<2x32xf32> -> vector<2x32xf32>
    %c0_6 = arith.constant 0 : index
    %c0_7 = arith.constant 0 : index
    %7 = vector.load %arg4[%c0_6, %c0_7] : memref<1x32xf32, #tpu.memory_space<vmem>>, vector<1x32xf32>
    %8 = vector.broadcast %7 : vector<1x32xf32> to vector<2x32xf32>
    %9 = arith.addf %6, %8 : vector<2x32xf32>
    %cst_8 = arith.constant dense<0xFF800000> : vector<2xf32>
    %10 = vector.multi_reduction <maximumf>, %9, %cst_8 [1] : vector<2x32xf32> to vector<2xf32>
    %11 = vector.shape_cast %10 : vector<2xf32> to vector<2x1xf32>
    %12 = vector.broadcast %11 : vector<2x1xf32> to vector<2x32xf32>
    %13 = arith.subf %9, %12 : vector<2x32xf32>
    %14 = math.exp %13 : vector<2x32xf32>
    %cst_9 = arith.constant dense<0.000000e+00> : vector<2xf32>
    %15 = vector.multi_reduction <add>, %14, %cst_9 [1] : vector<2x32xf32> to vector<2xf32>
    %16 = vector.shape_cast %15 : vector<2xf32> to vector<2x1xf32>
    %17 = vector.broadcast %16 : vector<2x1xf32> to vector<2x32xf32>
    %18 = arith.divf %14, %17 : vector<2x32xf32>
    %19 = arith.truncf %18 : vector<2x32xf32> to vector<2x32xbf16>
    %c0_10 = arith.constant 0 : index
    %c0_11 = arith.constant 0 : index
    %20 = vector.load %arg2[%c0_10, %c0_11] : memref<32x128xbf16, #tpu.memory_space<vmem>>, vector<32x128xbf16>
    %cst_12 = arith.constant dense<0.000000e+00> : vector<2x128xf32>
    %21 = tpu.matmul %19, %20, %cst_12 {dimension_numbers = #tpu.dot_dimension_numbers<[1], [0], [0], [1], [0, 0, 1, 1], [], []>} : vector<2x32xbf16>, vector<32x128xbf16>, vector<2x128xf32> -> vector<2x128xf32>
    %22 = vector.shape_cast %21 : vector<2x128xf32> to vector<2x1x128xf32>
    %23 = vector.shape_cast %22 : vector<2x1x128xf32> to vector<2x1x128xf32>
    %24 = vector.broadcast %23 : vector<2x1x128xf32> to vector<2x8x128xf32>
    %c0_13 = arith.constant 0 : index
    %c0_14 = arith.constant 0 : index
    %c0_15 = arith.constant 0 : index
    %25 = vector.load %arg6[%c0_13, %c0_14, %c0_15] : memref<2x8x128xf32, #tpu.memory_space<vmem>>, vector<2x8x128xf32>
    tpu.vector_store %arg6[%c0_13, %c0_14, %c0_15], %24 {strides = array<i32>} : memref<2x8x128xf32, #tpu.memory_space<vmem>>, vector<2x8x128xf32>,
    %c0_16 = arith.constant 0 : index
    %c0_17 = arith.constant 0 : index
    %26 = vector.load %arg5[%c0_16, %c0_17] : memref<16x2xi32, #tpu.memory_space<vmem>>, vector<16x2xi32>
    %27 = vector.extract_strided_slice %26 {offsets = [0, 0], sizes = [16, 1], strides = [1, 1]} : vector<16x2xi32> to vector<16x1xi32>
    %28 = vector.extract_strided_slice %26 {offsets = [0, 1], sizes = [16, 1], strides = [1, 1]} : vector<16x2xi32> to vector<16x1xi32>
    %29 = tpu.iota {dimensions = array<i32: 1>} : vector<16x256xi32>
    %30 = vector.broadcast %27 : vector<16x1xi32> to vector<16x256xi32>
    %31 = arith.cmpi eq, %29, %30 : vector<16x256xi32>
    %32 = arith.extui %31 : vector<16x256xi1> to vector<16x256xi32>
    %33 = arith.sitofp %32 : vector<16x256xi32> to vector<16x256xf32>
    %34 = arith.truncf %33 : vector<16x256xf32> to vector<16x256xbf16>
    %c0_18 = arith.constant 0 : index
    %c0_19 = arith.constant 0 : index
    %35 = vector.load %arg1[%c0_18, %c0_19] : memref<256x128xbf16, #tpu.memory_space<vmem>>, vector<256x128xbf16>
    %cst_20 = arith.constant dense<0.000000e+00> : vector<16x128xf32>
    %36 = tpu.matmul %34, %35, %cst_20 {dimension_numbers = #tpu.dot_dimension_numbers<[1], [0], [0], [1], [0, 0, 1, 1], [], []>} : vector<16x256xbf16>, vector<256x128xbf16>, vector<16x128xf32> -> vector<16x128xf32>
    %37 = arith.truncf %36 : vector<16x128xf32> to vector<16x128xbf16>
    %cst_21 = arith.constant dense<0.000000e+00> : vector<16x256xf32>
    %38 = tpu.matmul %37, %35, %cst_21 {dimension_numbers = #tpu.dot_dimension_numbers<[1], [1], [0], [0], [0, 0, 1, 0], [], []>} : vector<16x128xbf16>, vector<256x128xbf16>, vector<16x256xf32> -> vector<16x256xf32>
    %c0_22 = arith.constant 0 : index
    %c0_23 = arith.constant 0 : index
    %39 = vector.load %arg7[%c0_22, %c0_23] : memref<16x256xf32, #tpu.memory_space<vmem>>, vector<16x256xf32>
    tpu.vector_store %arg7[%c0_22, %c0_23], %38 {strides = array<i32>} : memref<16x256xf32, #tpu.memory_space<vmem>>, vector<16x256xf32>,
    %cst_24 = arith.constant dense<0xFF800000> : vector<16xf32>
    %40 = vector.multi_reduction <maximumf>, %38, %cst_24 [1] : vector<16x256xf32> to vector<16xf32>
    %41 = vector.shape_cast %40 : vector<16xf32> to vector<16x1xf32>
    %42 = vector.broadcast %41 : vector<16x1xf32> to vector<16x256xf32>
    %43 = arith.subf %38, %42 : vector<16x256xf32>
    %44 = math.exp %43 : vector<16x256xf32>
    %cst_25 = arith.constant dense<0.000000e+00> : vector<16xf32>
    %45 = vector.multi_reduction <add>, %44, %cst_25 [1] : vector<16x256xf32> to vector<16xf32>
    %46 = vector.shape_cast %45 : vector<16xf32> to vector<16x1xf32>
    %47 = math.log %46 : vector<16x1xf32>
    %48 = arith.addf %41, %47 : vector<16x1xf32>
    %49 = vector.broadcast %28 : vector<16x1xi32> to vector<16x256xi32>
    %50 = arith.cmpi eq, %29, %49 : vector<16x256xi32>
    %cst_26 = arith.constant 0.000000e+00 : f32
    %51 = vector.broadcast %cst_26 : f32 to vector<16x256xf32>
    %52 = arith.select %50, %38, %51 : vector<16x256xi1>, vector<16x256xf32>
    %cst_27 = arith.constant dense<0.000000e+00> : vector<16xf32>
    %53 = vector.multi_reduction <add>, %52, %cst_27 [1] : vector<16x256xf32> to vector<16xf32>
    %54 = vector.shape_cast %53 : vector<16xf32> to vector<16x1xf32>
    %c0_i32 = arith.constant 0 : i32
    %55 = vector.broadcast %c0_i32 : i32 to vector<16x1xi32>
    %56 = arith.cmpi ne, %28, %55 : vector<16x1xi32>
    %57 = arith.extui %56 : vector<16x1xi1> to vector<16x1xi32>
    %58 = arith.sitofp %57 : vector<16x1xi32> to vector<16x1xf32>
    %59 = arith.subf %48, %54 : vector<16x1xf32>
    %60 = arith.mulf %59, %58 : vector<16x1xf32>
    %61 = vector.shape_cast %60 : vector<16x1xf32> to vector<1x16x1xf32>
    %cst_28 = arith.constant dense<0.000000e+00> : vector<1xf32>
    %62 = vector.multi_reduction <add>, %61, %cst_28 [1, 2] : vector<1x16x1xf32> to vector<1xf32>
    %63 = vector.shape_cast %62 : vector<1xf32> to vector<1x1x1xf32>
    %64 = vector.extract %63[0, 0, 0] : f32 from vector<1x1x1xf32>
    %65 = vector.shape_cast %58 : vector<16x1xf32> to vector<1x16x1xf32>
    %cst_29 = arith.constant dense<0.000000e+00> : vector<1xf32>
    %66 = vector.multi_reduction <add>, %65, %cst_29 [1, 2] : vector<1x16x1xf32> to vector<1xf32>
    %67 = vector.shape_cast %66 : vector<1xf32> to vector<1x1x1xf32>
    %68 = vector.extract %67[0, 0, 0] : f32 from vector<1x1x1xf32>
    %69 = arith.divf %64, %68 : f32
    %70 = vector.broadcast %69 : f32 to vector<1x1xf32>
    %c0_30 = arith.constant 0 : index
    %c0_31 = arith.constant 0 : index
    %71 = vector.load %arg8[%c0_30, %c0_31] : memref<1x1xf32, #tpu.memory_space<vmem>>, vector<1x1xf32>
    tpu.vector_store %arg8[%c0_30, %c0_31], %70 {strides = array<i32>} : memref<1x1xf32, #tpu.memory_space<vmem>>, vector<1x1xf32>,
    return
  }
}

</mosaic_0001>

<bundles_post_ra>
// kernel: multibank_t5_forward.1
= control target key start
LH: loop header
LB: loop body
LE: loop exit
PB: predicated region body
PF: predicated region fallthrough
CT: control target
= control target key end

     0   :  { %14 = vsyncpa [#allocation3], 0  ;;  %v783_v4 = vmov 8.0   ;;  %s954_s0 = inlined_call_operand.vmem [shape: f32[2,8,128], index: 0, kind: input, shape index: {}]   ;;  %s955_s1 = inlined_call_operand.vmem [shape: bf16[256,128], index: 1, kind: input, shape index: {}]   ;;  %s956_s2 = inlined_call_operand.vmem [shape: bf16[32,128], index: 2, kind: input, shape index: {}]   ;;  %s957_s3 = inlined_call_operand.vmem [shape: bf16[32,128], index: 3, kind: input, shape index: {}]   ;;  %s958_s4 = inlined_call_operand.vmem [shape: f32[1,32], index: 4, kind: input, shape index: {}]   ;;  %s959_s5 = inlined_call_operand.vmem [shape: s32[16,2], index: 5, kind: input, shape index: {}]   ;;  %s960_s6 = inlined_call_operand.hbm [shape: f32[2,8,128], index: 6, kind: output, shape index: {0}]   ;;  %s961_s7 = inlined_call_operand.hbm [shape: f32[16,256], index: 7, kind: output, shape index: {1}]   ;;  %s962_s8 = inlined_call_operand.hbm [shape: f32[1,1], index: 8, kind: output, shape index: {2}]  }
   0x1   :  { %v640_v0 = vld [vmem:[%s957_s3 + $0x8] sm:$0xff]  ;;  %v29_v1 = vld [vmem:[%s954_s0] sm:$0xff]  ;;  %687 = vrcp.f32 %v783_v4 }
   0x2   :  { %v30_v2 = vld [vmem:[%s954_s0 + $0x8] sm:$0xff]  ;;  %v31_v3 = vrot.slane %v29_v1, 4  ;;  %88 = vmatpush.bf16.xpose.msra.mxu2 %v640_v0 }
   0x3   :  { %v37_v5 = vrot.slane %v30_v2, 4 }
   0x4   :  { %15 = vsyncpa [#allocation5], 0  ;;  %v32_v6 = vadd.f32 %v31_v3, %v29_v1  ;;  %v639_v9 = vld [vmem:[%s957_s3] sm:$0xff]  ;;  %vm66_vm1 = vcmask 1041409   ;;  %vm95_vm2 = vcmask 254976   ;;  %v650_v37 = vld [vmem:[%s955_s1 + $0x38] sm:$0xff]  ;;  %v164_v55 = vlaneseq }
   0x5   :  { %v38_v7 = vadd.f32 %v37_v5, %v30_v2  ;;  %v686_v31 = vld [vmem:[%s958_s4] ss:$0 sm:$0xff]  ;;  %v784_v38 = vmov 0   ;;  %v649_v39 = vld [vmem:[%s955_s1 + $0x30] sm:$0xff]  ;;  %344 = vmatpush.bf16.xpose.msra.mxu1 %v650_v37  ;;  %v648_v40 = vld [vmem:[%s955_s1 + $0x28] sm:$0xff]  ;;  %vm137_vm10 = vcmask 261120  }
   0x6   :  { %v33_v8 = vrot.slane %v32_v6, 2  ;;  %v860_v36 = vld [vmem:[%s959_s5] sm:$0xff]  ;;  %678 = vset.pattern.permute.xlu1 %v784_v38  ;;  %v875_v41 = vld [vmem:[%s959_s5 + $0x8] sm:$0xff]  ;;  %v646_v50 = vld [vmem:[%s955_s1 + $0x18] sm:$0xff]  ;;  %v909_v58 = vand.u32 127, %v164_v55  ;;  %s789_s24 = smov [#allocation4]  }
   0x7   :  { %v39_v10 = vrot.slane %v38_v7, 2  ;;  %v688_v11 = vpop.eup %687  ;;  %168 = vperm.xlu1 %678, %v860_v36   ;;  %v642_v47 = vld [vmem:[%s956_s2 + $0x8] sm:$0xff]  ;;  %v647_v48 = vld [vmem:[%s955_s1 + $0x20] sm:$0xff]  ;;  %v658_v51 = vld [vmem:[%s955_s1 + $0x78] sm:$0xff]  ;;  %v785_v63 = vmov 1.0|1.0  }
   0x8   :  { %v34_v12 = vadd.f32 %v33_v8, %v32_v6  ;;  %v44_v14 = vmul.f32 8.0, %v688_v11  ;;  %vm48_vm0 = vweird.f32 %v688_v11  ;;  %147 = vmatpush.bf16.msra.mxu3 %v642_v47  ;;  %v641_v49 = vld [vmem:[%s956_s2] sm:$0xff]  ;;  %358 = vmatpush.bf16.xpose.msra.mxu0 %v658_v51  ;;  %v645_v52 = vld [vmem:[%s955_s1 + $0x10] sm:$0xff]  ;;  %v644_v56 = vld [vmem:[%s955_s1 + $0x8] sm:$0xff]  ;;  %s514_s25 = sshll.u32 %s789_s24, 4  ;;  %s516_s28 = sshll.u32 %s961_s7, 4  ;;  %s515_s25 = int_to_ptr.vmem [resolvable:$true] %s514_s25  ;;  %s517_s28 = int_to_ptr.hbm [resolvable:$true] %s516_s28 }
   0x9   :  { %v40_v13 = vadd.f32 %v39_v10, %v38_v7  ;;  %v657_v53 = vld [vmem:[%s955_s1 + $0x70] sm:$0xff]  ;;  %v656_v57 = vld [vmem:[%s955_s1 + $0x68] sm:$0xff]  ;;  %v643_v59 = vld [vmem:[%s955_s1] sm:$0xff]  ;;  %s790_s29 = smov 256   ;;  %s791_s30 = smov 16  }
   0xa   :  { %v35_v15 = vrot.slane %v34_v12, 1  ;;  %89 = vmatpush.bf16.xpose.msra.mxu2 %v639_v9  ;;  %v45_v17 = vsub.f32 1.0, %v44_v14  ;;  %v655_v60 = vld [vmem:[%s955_s1 + $0x60] sm:$0xff]  ;;  %v654_v62 = vld [vmem:[%s955_s1 + $0x58] sm:$0xff]  ;;  %v653_v0 = vld [vmem:[%s955_s1 + $0x50] sm:$0xff]  ;;  %s503_s11 = sshll.u32 %s960_s6, 4  ;;  %s504_s11 = int_to_ptr.hbm [resolvable:$true] %s503_s11 }
   0xb   :  { %v41_v16 = vrot.slane %v40_v13, 1  ;;  %v652_v1 = vld [vmem:[%s955_s1 + $0x48] sm:$0xff]  ;;  %v651_v2 = vld [vmem:[%s955_s1 + $0x40] sm:$0xff]  ;;  %s788_s1 = smov 127   ;;  %s792_s12 = smov [#allocation2]  }
   0xc   :  { %v46_v18 = vmul.f32 %v688_v11, %v45_v17  ;;  %v36_v19 = vadd.f32 %v35_v15, %v34_v12  ;;  %148 = vmatpush.bf16.msra.mxu3 %v641_v49  ;;  %v786_v17 = vmov 1   ;;  %s501_s2 = sshll.u32 %s792_s12, 4  ;;  %s793_s0 = smov 128   ;;  %s502_s2 = int_to_ptr.vmem [resolvable:$true] %s501_s2 }
   0xd   :  { %v42_v20 = vadd.f32 %v41_v16, %v40_v13  ;;  %345 = vmatpush.bf16.xpose.msra.mxu1 %v649_v39  ;;  %v933_v16 = vadd.s32 128, %v909_v58  ;;  %679 = vset.pattern.permute.xlu0 %v786_v17  ;;  %s794_s3 = smov 8   ;;  %s795_s6 = smov [#allocation6]  }
   0xe   :  { %v47_v21 = vadd.f32 %v688_v11, %v46_v18  ;;  %s528_s14 = sshll.u32 %s795_s6, 4  ;;  %s530_s4 = sshll.u32 %s962_s8, 4  ;;  %s529_s14 = int_to_ptr.vmem [resolvable:$true] %s528_s14  ;;  %s531_s4 = int_to_ptr.hbm [resolvable:$true] %s530_s4 }
   0xf   :  { %171 = vperm.xlu1 %678, %v875_v41  }
  0x10   :  { %v49_v22 = vsel %vm48_vm0, %v688_v11, %v47_v21  ;;  %329 = vmatpush.bf16.msrb.mxu3 %v658_v51  ;;  %359 = vmatpush.bf16.xpose.msra.mxu0 %v657_v53 }
  0x11   :  { %v50_v23 = vmul.f32 %v49_v22, %v36_v19  ;;  %v51_v24 = vmul.f32 %v49_v22, %v42_v20 }
  0x12   :  { %315 = vmatpush.bf16.msrb.mxu2 %v650_v37 }
  0x13   :  { %v52_v25 = vpack.c.bf16 %v50_v23, %v50_v23  ;;  %v53_v26 = vpack.c.bf16 %v51_v24, %v51_v24 }
  0x14   :  { %330 = vmatpush.bf16.msrb.mxu3 %v657_v53 }
  0x15   :  { %v64_v27 = vunpack.c.l.b16 %v52_v25  ;;  %v65_v28 = vunpack.c.l.b16 %v53_v26  ;;  %346 = vmatpush.bf16.xpose.msra.mxu1 %v648_v40 }
  0x16   :  { %316 = vmatpush.bf16.msrb.mxu2 %v649_v39 }
  0x17   :  { %v67_v29 = vsel %vm66_vm1, %v65_v28, %v64_v27  ;;  %680 = vset.pattern.permute.xlu1 %v786_v17 }
  0x18   :  { %v68_v30 = vpack.c.b16 %v67_v29, %v67_v29  ;;  %331 = vmatpush.bf16.msrb.mxu3 %v656_v57  ;;  %360 = vmatpush.bf16.xpose.msra.mxu0 %v656_v57 }
  0x19   :  { %410 = vperm.xlu1 %680, %v875_v41  }
  0x1a   :  { %90 = vmatmul.bf16.vlgmr.msra.gmra.mxu2 %v68_v30 }
  0x1b   :  { %317 = vmatpush.bf16.msrb.mxu2 %v648_v40 }
  0x1c   :  { %332 = vmatpush.bf16.msrb.mxu3 %v655_v60 }
  0x1d   :  { %347 = vmatpush.bf16.xpose.msra.mxu1 %v647_v48 }
  0x1f   :  { %318 = vmatpush.bf16.msrb.mxu2 %v647_v48 }
  0x20   :  { %333 = vmatpush.bf16.msrb.mxu3 %v654_v62  ;;  %361 = vmatpush.bf16.xpose.msra.mxu0 %v655_v60 }
  0x23   :  { %319 = vmatpush.bf16.msrb.mxu2 %v646_v50 }
  0x24   :  { %334 = vmatpush.bf16.msrb.mxu3 %v653_v0 }
  0x25   :  { %348 = vmatpush.bf16.xpose.msra.mxu1 %v646_v50 }
  0x27   :  { %320 = vmatpush.bf16.msrb.mxu2 %v645_v52 }
  0x28   :  { %335 = vmatpush.bf16.msrb.mxu3 %v652_v1  ;;  %362 = vmatpush.bf16.xpose.msra.mxu0 %v654_v62 }
  0x2b   :  { %321 = vmatpush.bf16.msrb.mxu2 %v644_v56 }
  0x2c   :  { %336 = vmatpush.bf16.msrb.mxu3 %v651_v2 }
  0x2d   :  { %349 = vmatpush.bf16.xpose.msra.mxu1 %v645_v52 }
  0x2f   :  { %322 = vmatpush.bf16.msrb.mxu2 %v643_v59 }
  0x30   :  { %363 = vmatpush.bf16.xpose.msra.mxu0 %v653_v0 }
  0x35   :  { %350 = vmatpush.bf16.xpose.msra.mxu1 %v644_v56 }
  0x38   :  { %364 = vmatpush.bf16.xpose.msra.mxu0 %v652_v1 }
  0x3d   :  { %351 = vmatpush.bf16.xpose.msra.mxu1 %v643_v59 }
  0x40   :  { %365 = vmatpush.bf16.xpose.msra.mxu0 %v651_v2 }
  0x79   :  { %v169_v54 = vpop.permute.xlu1 %168 }
  0x7a   :  { %vm173_vm3 = vcmp.eq.s32.totalorder %v909_v58, %v169_v54  ;;  %vm174_vm11 = vcmp.eq.s32.totalorder %v933_v16, %v169_v54 }
  0x81   :  { %v172_v61 = vpop.permute.xlu1 %171 }
  0x82   :  { %vm175_vm4 = vcmp.eq.s32.totalorder %v909_v58, %v172_v61  ;;  %vm176_vm12 = vcmp.eq.s32.totalorder %v933_v16, %v172_v61 }
  0x83   :  { %vm633_vm5 = vmpackc.low %vm175_vm4, %vm173_vm3  ;;  %vm427_vm3 = vcmp.ne.s32.totalorder %v875_v41, 0  ;;  %vm444_vm4 = vcmask 7168  }
  0x84   :  { %634 = vmatmul.msk.bf16.vlgmr.msrb.gmra.mxu2 %vm633_vm5, %v785_v63  ;;  %vm635_vm13 = vmpackc.low %vm176_vm12, %vm174_vm11 }
  0x8b   :  { %v411_v56 = vpop.permute.xlu1 %410 }
  0x8c   :  { %vm414_vm0 = vcmp.eq.s32.totalorder %v909_v58, %v411_v56  ;;  %vm415_vm1 = vcmp.eq.s32.totalorder %v933_v16, %v411_v56 }
  0x9d   :  { %v91_v32 = vpop.f32.mrf.mxu2 }
  0x9e   :  { %v92_v33 = vadd.f32 %v686_v31, %v91_v32 }
  0xa0   :  { %v96_v34 = vsel %vm95_vm2, %v92_v33, -inf }
  0xa1   :  { %97 = vmax.xlane.f32.xlu0 %v96_v34 }
  0xa5   :  { %v93_v35 = vpop.f32.mrf.mxu2 }
 0x107   :  { %v324_v23 = vpop.f32.mrf.mxu2 }
 0x10f   :  { %v326_v25 = vpop.f32.mrf.mxu2 }
 0x114   :  { %v98_v42 = vpop.xlane.xlu0 %97 }
 0x115   :  { %v99_v43 = vsub.f32 %v92_v33, %v98_v42 }
 0x117   :  { %v100_v44 = vmul.f32 1.442695, %v99_v43 }
 0x119   :  { %689 = vpow2.f32 %v100_v44 }
 0x11f   :  { %v878_v45 = vpop.eup %689 }
 0x120   :  { %v102_v46 = vsel %vm95_vm2, %v878_v45, 0.0  ;;  %vm426_vm2 = vcmp.ne.s32.totalorder %v860_v36, 0 }
 0x121   :  { %103 = vadd.xlane.f32.xlu0 %v102_v46 }
 0x135   :  { %407 = vperm.xlu0 %679, %v860_v36  }
 0x194   :  { %v104_v3 = vpop.xlane.xlu0 %103 }
 0x195   :  { %691 = vrcp.f32 %v104_v3  ;;  %v116_v7 = vand.u32 2147483648, %v104_v3  ;;  %v114_v9 = vand.u32 2147483647, %v104_v3  ;;  %vm110_vm7 = vweird.f32 %v104_v3 }
 0x197   :  { %v117_v11 = vor.u32 1.1754944e-38, %v116_v7  ;;  %vm115_vm9 = vcmp.eq.f32.partialorder %v114_v9, 8.507059e+37 }
 0x19b   :  { %v692_v4 = vpop.eup %691 }
 0x19c   :  { %v106_v5 = vmul.f32 %v692_v4, %v104_v3  ;;  %vm111_vm6 = vweird.f32 %v692_v4 }
 0x19d   :  { %vm112_vm8 = vmor %vm110_vm7, %vm111_vm6 }
 0x19e   :  { %v107_v6 = vsub.f32 1.0, %v106_v5  ;;  %v787_v5 = vmov 0.0  }
 0x1a0   :  { %v108_v8 = vmul.f32 %v692_v4, %v107_v6 }
 0x1a2   :  { %v109_v10 = vadd.f32 %v692_v4, %v108_v8 }
 0x1a4   :  { %v113_v12 = vsel %vm112_vm8, %v692_v4, %v109_v10 }
 0x1a5   :  { %v118_v13 = vsel %vm115_vm9, %v117_v11, %v113_v12  ;;  %v638_v11 = vsel %vm427_vm3, 1.0, %v787_v5  ;;  %vm495_vm9 = vcmask 0  }
 0x1a6   :  { %v119_v14 = vmul.f32 %v878_v45, %v118_v13 }
 0x1a7   :  { %v408_v50 = vpop.permute.xlu0 %407 }
 0x1a8   :  { %v120_v15 = vpack.c.bf16 %v119_v14, %v119_v14  ;;  %vm412_vm14 = vcmp.eq.s32.totalorder %v909_v58, %v408_v50  ;;  %vm413_vm15 = vcmp.eq.s32.totalorder %v933_v16, %v408_v50  ;;  %v637_v58 = vsel %vm426_vm2, 1.0, %v787_v5 }
 0x1a9   :  { %v681_v14 = vpack.i.bf16 %v638_v11, %v637_v58 }
 0x1aa   :  { %564 = vmatmul.msk.bf16.vlgmr.msra.gmra.mxu3 %vm137_vm10, %v120_v15 }
 0x1ba   :  { %636 = vmatmul.msk.bf16.vlgmr.msrb.gmra.mxu3 %vm635_vm13, %v785_v63 }
 0x22d   :  { %v150_v18 = vpop.f32.mrf.mxu3 }
 0x22e   :  { %v155_v19 = vrot.slane %v150_v18, 1  ;;  %v156_v20 = vperm.slane %v150_v18, 0 }
 0x230   :  { %v157_v21 = vperm.slane %v155_v19, 0  ;;  %160 = vst [vmem:[#allocation2] sm:$0xff] %v156_v20 }
 0x232   :  { %161 = vst [vmem:[#allocation2 + $0x8] sm:$0xff] %v157_v21 }
 0x233   :  { %509 = dma.vmem_to_hbm [thread:$0]  %s502_s2, 256, %s504_s11, [#allocation3], %s793_s0, %s793_s0, %s794_s3  }
 0x235   :  { %v152_v22 = vpop.f32.mrf.mxu3 }
 0x23d   :  { %v338_v24 = vpop.f32.mrf.mxu3 }
 0x23e   :  { %v339_v27 = vadd.f32 %v338_v24, %v324_v23 }
 0x245   :  { %v340_v26 = vpop.f32.mrf.mxu3 }
 0x246   :  { %v341_v28 = vadd.f32 %v340_v26, %v326_v25 }
 0x248   :  { %v343_v29 = vpack.c.bf16 %v341_v28, %v339_v27 }
 0x24a   :  { %352 = vmatmul.bf16.vlgmr.msra.gmra.mxu1 %v343_v29  ;;  %366 = vmatmul.bf16.vlgmr.msra.gmra.mxu0 %v343_v29 }
 0x2c7   :  { %v353_v30 = vpop.f32.mrf.mxu1  ;;  %v367_v31 = vpop.f32.mrf.mxu0 }
 0x2c8   :  { %372 = vst [vmem:[#allocation4] sm:$0xff] %v353_v30  ;;  %v376_v32 = vmax.f32 %v353_v30, %v367_v31  ;;  %v416_v52 = vsel %vm412_vm14, %v353_v30, 0.0  ;;  %v417_v53 = vsel %vm413_vm15, %v367_v31, 0.0 }
 0x2c9   :  { %373 = vst [vmem:[#allocation4 + $0x8] sm:$0xff] %v367_v31  ;;  %v420_v59 = vadd.f32 %v417_v53, %v416_v52 }
 0x2ca   :  { %377 = vmax.xlane.f32.xlu2 %v376_v32 }
 0x2cf   :  { %v355_v33 = vpop.f32.mrf.mxu1  ;;  %v369_v34 = vpop.f32.mrf.mxu0 }
 0x2d0   :  { %374 = vst [vmem:[#allocation4 + $0x10] sm:$0xff] %v355_v33  ;;  %v379_v35 = vmax.f32 %v355_v33, %v369_v34  ;;  %v418_v60 = vsel %vm414_vm0, %v355_v33, 0.0  ;;  %v419_v61 = vsel %vm415_vm1, %v369_v34, 0.0 }
 0x2d1   :  { %375 = vst [vmem:[#allocation4 + $0x18] sm:$0xff] %v369_v34  ;;  %v423_v62 = vadd.f32 %v419_v61, %v418_v60 }
 0x2d2   :  { %380 = vmax.xlane.f32.xlu2 %v379_v35  ;;  %522 = dma.vmem_to_hbm [thread:$0]  %s515_s25, 512, %s517_s28, [#allocation5], %s790_s29, %s790_s29, %s791_s30  }
 0x33d   :  { %v378_v37 = vpop.xlane.xlu2 %377 }
 0x33e   :  { %v382_v38 = vsub.f32 %v353_v30, %v378_v37  ;;  %v383_v39 = vsub.f32 %v367_v31, %v378_v37 }
 0x340   :  { %v386_v40 = vmul.f32 1.442695, %v382_v38  ;;  %v388_v42 = vmul.f32 1.442695, %v383_v39 }
 0x342   :  { %693 = vpow2.f32 %v386_v40 }
 0x343   :  { %695 = vpow2.f32 %v388_v42 }
 0x345   :  { %v381_v43 = vpop.xlane.xlu2 %380 }
 0x346   :  { %v384_v44 = vsub.f32 %v355_v33, %v381_v43  ;;  %v385_v45 = vsub.f32 %v369_v34, %v381_v43 }
 0x348   :  { %v694_v46 = vpop.eup %693  ;;  %v390_v47 = vmul.f32 1.442695, %v384_v44  ;;  %v392_v48 = vmul.f32 1.442695, %v385_v45 }
 0x349   :  { %v696_v49 = vpop.eup %695 }
 0x34a   :  { %697 = vpow2.f32 %v390_v47  ;;  %v394_v51 = vadd.f32 %v696_v49, %v694_v46 }
 0x34b   :  { %699 = vpow2.f32 %v392_v48 }
 0x34c   :  { %395 = vadd.xlane.f32.xlu2 %v394_v51 }
 0x350   :  { %v698_v54 = vpop.eup %697 }
 0x351   :  { %v700_v55 = vpop.eup %699 }
 0x352   :  { %v397_v57 = vadd.f32 %v700_v55, %v698_v54 }
 0x354   :  { %398 = vadd.xlane.f32.xlu1 %v397_v57  ;;  %421 = vadd.xlane.f32.xlu2 %v420_v59 }
 0x35c   :  { %424 = vadd.xlane.f32.xlu2 %v423_v62 }
 0x3bf   :  { %v396_v63 = vpop.xlane.xlu2 %395 }
 0x3c0   :  { %701 = vlog2.f32 %v396_v63 }
 0x3c6   :  { %v702_v0 = vpop.eup %701 }
 0x3c7   :  { %v401_v1 = vmul.f32 0.6931472, %v702_v0  ;;  %v399_v2 = vpop.xlane.xlu1 %398  ;;  %v422_v3 = vpop.xlane.xlu2 %421 }
 0x3c8   :  { %703 = vlog2.f32 %v399_v2 }
 0x3c9   :  { %v404_v4 = vadd.f32 %v401_v1, %v378_v37 }
 0x3cb   :  { %v432_v6 = vsub.f32 %v404_v4, %v422_v3 }
 0x3cd   :  { %v434_v7 = vmul.f32 %v637_v58, %v432_v6 }
 0x3ce   :  { %v704_v8 = vpop.eup %703 }
 0x3cf   :  { %v403_v9 = vmul.f32 0.6931472, %v704_v8  ;;  %438 = vrot.lane.b32.xlu2 %v434_v7, %s788_s1  ;;  %v425_v12 = vpop.xlane.xlu2 %424 }
 0x3d1   :  { %v405_v10 = vadd.f32 %v403_v9, %v381_v43 }
 0x3d3   :  { %v433_v13 = vsub.f32 %v405_v10, %v425_v12 }
 0x3d5   :  { %v435_v36 = vmul.f32 %v638_v11, %v433_v13 }
 0x3d7   :  { %440 = vrot.lane.b32.xlu0 %v435_v36, %s788_s1 }
 0x3df   :  { %682 = vrot.lane.b32.xlu0 %v681_v14, %s788_s1 }
 0x429   :  { %v439_v15 = vpop.permute.xlu2 %438 }
 0x42a   :  { %v445_v17 = vsel %vm444_vm4, %v439_v15, 0.0 }
 0x449   :  { %v441_v16 = vpop.permute.xlu0 %440 }
 0x44a   :  { %v446_v18 = vsel %vm444_vm4, %v441_v16, 0.0 }
 0x44b   :  { %v447_v19 = vadd.f32 %v446_v18, %v445_v17 }
 0x44d   :  { %448 = vadd.xlane.f32.xlu2 %v447_v19 }
 0x451   :  { %v683_v20 = vpop.permute.xlu0 %682 }
 0x452   :  { %v685_v41 = vunpack.i.h.bf16 %v683_v20  ;;  %v684_v21 = vunpack.i.l.bf16 %v683_v20 }
 0x454   :  { %v465_v22 = vsel %vm444_vm4, %v684_v21, 0.0  ;;  %v466_v23 = vsel %vm444_vm4, %v685_v41, 0.0 }
 0x455   :  { %v467_v24 = vadd.f32 %v466_v23, %v465_v22 }
 0x457   :  { %468 = vadd.xlane.f32.xlu1 %v467_v24 }
 0x4c0   :  { %v449_v25 = vpop.xlane.xlu2 %448 }
 0x4c1   :  { %v450_v26 = vrot.slane %v449_v25, 4 }
 0x4c3   :  { %v451_v27 = vadd.f32 %v450_v26, %v449_v25 }
 0x4c5   :  { %v452_v28 = vrot.slane %v451_v27, 2 }
 0x4c7   :  { %v453_v29 = vadd.f32 %v452_v28, %v451_v27 }
 0x4c9   :  { %v454_v30 = vrot.slane %v453_v29, 1 }
 0x4ca   :  { %v469_v31 = vpop.xlane.xlu1 %468 }
 0x4cb   :  { %v470_v32 = vrot.slane %v469_v31, 4  ;;  %v455_v33 = vadd.f32 %v454_v30, %v453_v29 }
 0x4cd   :  { %v471_v34 = vadd.f32 %v470_v32, %v469_v31  ;;  %659 = vpush %v455_v33 }
 0x4cf   :  { %v472_v35 = vrot.slane %v471_v34, 2 }
 0x4d1   :  { %v473_v37 = vadd.f32 %v472_v35, %v471_v34 }
 0x4d3   :  { %v474_v38 = vrot.slane %v473_v37, 1 }
 0x4d5   :  { %v475_v39 = vadd.f32 %v474_v38, %v473_v37 }
 0x4d7   :  { %661 = vpush %v475_v39 }
 0x4fe   :  { %s660_s7 = spop %659 }
 0x508   :  { %s662_s13 = spop %661 }
 0x509   :  { %v477_v40 = vstv %s662_s13 }
 0x50a   :  { %705 = vrcp.f32 %v477_v40  ;;  %v489_v45 = vand.u32 2147483648, %v477_v40  ;;  %v487_v47 = vand.u32 2147483647, %v477_v40  ;;  %vm483_vm6 = vweird.f32 %v477_v40 }
 0x50c   :  { %v490_v49 = vor.u32 1.1754944e-38, %v489_v45  ;;  %vm488_vm8 = vcmp.eq.f32.partialorder %v487_v47, 8.507059e+37 }
 0x510   :  { %v706_v42 = vpop.eup %705 }
 0x511   :  { %v479_v43 = vmul.f32 %v706_v42, %v477_v40  ;;  %vm484_vm5 = vweird.f32 %v706_v42 }
 0x512   :  { %vm485_vm7 = vmor %vm483_vm6, %vm484_vm5 }
 0x513   :  { %v480_v44 = vsub.f32 1.0, %v479_v43 }
 0x515   :  { %v481_v46 = vmul.f32 %v706_v42, %v480_v44 }
 0x517   :  { %v482_v48 = vadd.f32 %v706_v42, %v481_v46 }
 0x519   :  { %v486_v50 = vsel %vm485_vm7, %v706_v42, %v482_v48 }
 0x51a   :  { %v491_v51 = vsel %vm488_vm8, %v490_v49, %v486_v50 }
 0x51b   :  { %663 = vpush %v491_v51 }
 0x54c   :  { %s664_s17 = spop %663 }
 0x54d   :  { %s493_s18 = smul.f32 %s664_s17, %s660_s7 }
 0x54f   :  { %v494_v52 = vstv %s493_s18 }
 0x550   :  { %496 = vst.msk [vmem:[#allocation6] sm:$0x1] %vm495_vm9, %v494_v52 }
 0x551   :  { %533 = dma.vmem_to_hbm [thread:$0]  %s529_s14, 16, %s531_s4, [#allocation5]  }
 0x552   :  { %779 = dma.done.wait [#allocation3], 256  }
 0x553   :  { %780 = vsyncadd [#allocation3], 4294967040 }
 0x554   :  { %781 = dma.done.wait [#allocation5], 528  }
 0x555   :  { %782 = vsyncadd [#allocation5], 4294966768 }
 0x556   :  { %546 = vsyncpa [#allocation3], 1 }
 0x557   :  { %547 = vsyncpa [#allocation5], 1 }

</bundles_post_ra>
